<compile_context>
chip_gen: v6e
topology: v6e:2x2x1
jax: 0.10.0
libtpu: 0.0.40
codegen_flags: <defaults>
</compile_context>

<pallas_src>
import functools
import math

import jax
import jax.numpy as jnp
from jax.experimental import pallas as pl
from jax.experimental.pallas import tpu as pltpu

_LANE = 128          # lane width (last dim) for weight N dims
_SUBLANE_BF16 = 16   # bf16 sublane packing (batch/row dim multiple)


def _round_up(x: int, m: int) -> int:
    return (x + m - 1) // m * m


def _fused_mlp_kernel(x_ref, *refs, num_layers: int):
    """Fused MLP forward on one (tile_b, d_in) batch tile.

    refs = (w_0, b_0, w_1, b_1, ..., w_{L-1}, b_{L-1}, o_ref)
      w_i : bf16 (K_i, N_i_pad)   (K_0 = true d_in, K_{i>0} = 128-padded)
      b_i : f32  (1, N_i_pad)
    bf16 MXU operands, f32 accumulation; bias-add + ReLU stay f32.
    Dropout is the identity (eval-mode forward).
    """
    o_ref = refs[-1]
    h = x_ref[...]                                    # bf16 (tile_b, d_in)
    for i in range(num_layers):                       # static unroll over layers
        w_ref = refs[2 * i]
        b_ref = refs[2 * i + 1]
        y = jnp.dot(h, w_ref[...], preferred_element_type=jnp.float32)
        y = y + b_ref[...]                            # (tile_b, N) + (1, N), f32
        if i != num_layers - 1:
            y = jnp.maximum(y, 0.0)                   # ReLU; Dropout == identity (eval)
            h = y.astype(jnp.bfloat16)                # bf16 MXU operand for next layer
        else:
            h = y
    o_ref[...] = h.astype(o_ref.dtype)


def init_mlp_params(key, d_in, embedding_dim, d_out):
    """Deterministic init mirroring nn.Linear default (uniform +/- 1/sqrt(fan_in)).

    Weights are stored as (d_in, d_out) == transpose of nn.Linear's (d_out, d_in),
    so the forward computes x @ W + b.
    """
    params = []
    dims = [d_in] + list(embedding_dim) + [d_out]
    for i in range(len(dims) - 1):
        fan_in, fan_out = dims[i], dims[i + 1]
        key, kw, kb = jax.random.split(key, 3)
        bound = 1.0 / math.sqrt(fan_in)
        w = jax.random.uniform(kw, (fan_in, fan_out), jnp.float32, -bound, bound)
        b = jax.random.uniform(kb, (fan_out,), jnp.float32, -bound, bound)
        params.append((w, b))
    return params


def pad_mlp_params(params):
    """One-time host-side prep.

    * Output (N) dims are zero-padded to 128 lanes (lane-dense stores / MXU tiles).
    * The FIRST weight keeps its true K (= d_in) so the unpadded x can be
      contracted directly; later K dims are 128-padded to match the previous
      layer's padded activation width.
    * Weights are pre-cast to bf16 (MXU operand dtype); biases stay f32 (1, N_pad).
    """
    padded = []
    for i, (w, b) in enumerate(params):
        d_k, d_n = w.shape
        d_k_p = d_k if i == 0 else _round_up(d_k, _LANE)
        d_n_p = _round_up(d_n, _LANE)
        w_p = jnp.zeros((d_k_p, d_n_p), jnp.float32).at[:d_k, :d_n].set(w)
        b_p = jnp.zeros((1, d_n_p), jnp.float32).at[0, :d_n].set(b)
        padded.append((w_p.astype(jnp.bfloat16), b_p))
    return padded


def _vmem_capacity_bytes() -> int:
    try:
        return int(pltpu.get_tpu_info().vmem_capacity_bytes)
    except Exception:
        return 64 << 20  # conservative default (v7x per-TensorCore VMEM)


def mlp_forward(x, padded_params, d_out, out_dtype=jnp.float32):
    """MLP.forward: blocks (Linear->ReLU->Dropout[eval=id]) then head Linear.

    x: (B, d_in) float; padded_params from pad_mlp_params; returns (B, d_out).
    """
    # TODO(synk): training-mode dropout would need pltpu.prng_seed /
    # prng_random_bits inside the kernel; eval-mode dropout is the identity.
    x = x.astype(jnp.bfloat16)          # bf16 streaming halves the dominant HBM read
    B, d_in = x.shape
    num_layers = len(padded_params)
    assert d_in == padded_params[0][0].shape[0]
    d_out_pad = padded_params[-1][0].shape[1]
    assert d_out <= d_out_pad

    out_itemsize = jnp.dtype(out_dtype).itemsize
    widest = max([d_in] + [w.shape[1] for w, _ in padded_params])
    weight_bytes = sum(int(w.size) * w.dtype.itemsize + int(b.size) * b.dtype.itemsize
                       for w, b in padded_params)

    vmem_cap = _vmem_capacity_bytes()

    # ---- batch tiling (generation-aware, VMEM-budgeted) ---------------------
    b_pad = _round_up(max(B, 1), _SUBLANE_BF16)       # pad rows to sublane multiple only
    hard_cap = 2048 if vmem_cap <= (64 << 20) else 4096
    per_row = (2 * d_in * 2                           # double-buffered bf16 input tile
               + 2 * d_out_pad * out_itemsize         # double-buffered output tile
               + 3 * widest * 4)                      # live f32 activation headroom
    budget = int(vmem_cap * 0.7) - 2 * weight_bytes
    cap_rows = max(_SUBLANE_BF16, budget // per_row)
    tile_b = min(hard_cap, cap_rows, b_pad)
    tile_b = max(_SUBLANE_BF16, tile_b // _SUBLANE_BF16 * _SUBLANE_BF16)
    # Prefer >=2 grid tiles so v7x's second TensorCore has work (negligible cost
    # on single-TC v5e/v6e: one extra ~0.35us grid step).
    if pl.cdiv(b_pad, tile_b) == 1 and tile_b >= 2 * _SUBLANE_BF16:
        tile_b = _round_up(pl.cdiv(b_pad, 2), _SUBLANE_BF16)

    grid = (pl.cdiv(b_pad, tile_b),)

    if b_pad != B:
        x = jnp.zeros((b_pad, d_in), x.dtype).at[:B].set(x)

    flat_wb = []
    for w_p, b_p in padded_params:
        flat_wb.extend([w_p, b_p])

    # Raise the scoped-VMEM limit (defaults are only 16/32 MiB) to the actual
    # working set + headroom, capped below physical VMEM.
    work_bytes = (2 * weight_bytes
                  + 2 * tile_b * d_in * 2
                  + 2 * tile_b * d_out_pad * out_itemsize
                  + 4 * tile_b * widest * 4)
    vmem_limit = int(min(vmem_cap * 0.98, work_bytes + (16 << 20)))
    vmem_limit = int(min(max(vmem_limit, 32 << 20), vmem_cap * 0.98))

    flops = sum(2 * b_pad * w.shape[0] * w.shape[1] for w, _ in padded_params)
    bytes_accessed = (b_pad * d_in * 2                    # bf16 input stream
                      + b_pad * d_out_pad * out_itemsize  # output stream
                      + weight_bytes)                     # resident weights/biases
    cost = pl.CostEstimate(flops=flops, transcendentals=0,
                           bytes_accessed=bytes_accessed)

    kernel = functools.partial(_fused_mlp_kernel, num_layers=num_layers)
    out_shape = jax.ShapeDtypeStruct((b_pad, d_out_pad), out_dtype)
    out_specs = pl.BlockSpec((tile_b, d_out_pad), lambda i: (i, 0))
    compiler_params = pltpu.CompilerParams(
        dimension_semantics=("parallel",),     # shards batch tiles across TCs (v7x)
        vmem_limit_bytes=vmem_limit)

    def _build(single_buffer_weights: bool):
        in_specs = [pl.BlockSpec((tile_b, d_in), lambda i: (i, 0))]
        for w_p, b_p in padded_params:
            if single_buffer_weights:
                # Grid-invariant weights/biases: single-buffer, reclaim VMEM.
                in_specs.append(pl.BlockSpec(w_p.shape, lambda i: (0, 0),
                                             pipeline_mode=pl.Buffered(1)))
                in_specs.append(pl.BlockSpec(b_p.shape, lambda i: (0, 0),
                                             pipeline_mode=pl.Buffered(1)))
            else:
                in_specs.append(pl.BlockSpec(w_p.shape, lambda i: (0, 0)))
                in_specs.append(pl.BlockSpec(b_p.shape, lambda i: (0, 0)))
        return pl.pallas_call(
            kernel,
            out_shape=out_shape,
            grid=grid,
            in_specs=in_specs,
            out_specs=out_specs,
            compiler_params=compiler_params,
            cost_estimate=cost,
        )

    try:
        out_p = _build(single_buffer_weights=hasattr(pl, "Buffered"))(x, *flat_wb)
    except Exception:
        # Fallback: default (double-buffered) specs for the invariant weights.
        out_p = _build(single_buffer_weights=False)(x, *flat_wb)

    return out_p[:B, :d_out]


if __name__ == "__main__":
    # Small shapes consistent with a tabular MLP:
    #   d_in=16, hidden layers [32, 32], d_out=8, batch=8
    B, D_IN, D_OUT = 8, 16, 8
    EMBEDDING_DIM = [32, 32]
    DROPOUT = 0.1  # unused at inference (Dropout is identity in eval mode)

    key = jax.random.PRNGKey(0)
    key, kx = jax.random.split(key)
    x = jax.random.normal(kx, (B, D_IN), jnp.float32)

    params = init_mlp_params(key, D_IN, EMBEDDING_DIM, D_OUT)
    padded_params = pad_mlp_params(params)

    out = mlp_forward(x, padded_params, D_OUT)
    out = jax.block_until_ready(out)
    assert out.shape == (B, D_OUT)
    assert out.dtype == jnp.float32

    # Reference 1: same numerics as the kernel (bf16 streaming + bf16 MXU, f32 accum).
    h = x.astype(jnp.bfloat16)
    for i, (w, b) in enumerate(params):
        y = jnp.dot(h, w.astype(jnp.bfloat16),
                    preferred_element_type=jnp.float32) + b
        if i != len(params) - 1:
            h = jnp.maximum(y, 0.0).astype(jnp.bfloat16)
        else:
            h = y
    ref_bf16 = h
    assert jnp.allclose(out, ref_bf16, atol=1e-4, rtol=1e-4), (
        jnp.max(jnp.abs(out - ref_bf16)))

    # Reference 2: pure-f32 PyTorch-equivalent forward (loose tolerance for bf16 path).
    ref_f32 = x.astype(jnp.float32)
    for i, (w, b) in enumerate(params):
        ref_f32 = ref_f32 @ w + b
        if i != len(params) - 1:
            ref_f32 = jnp.maximum(ref_f32, 0.0)
    assert jnp.allclose(out, ref_f32, atol=5e-2, rtol=5e-2), (
        jnp.max(jnp.abs(out - ref_f32)))

    print("KERNEL_OK")
</pallas_src>

<mosaic_0001>
module attributes {stable_mosaic.version = 11 : i64} {
  func.func @_fused_mlp_kernel(%arg0: i32, %arg1: memref<16x16xbf16, #tpu.memory_space<vmem>>, %arg2: memref<16x128xbf16, #tpu.memory_space<vmem>>, %arg3: memref<1x128xf32, #tpu.memory_space<vmem>>, %arg4: memref<128x128xbf16, #tpu.memory_space<vmem>>, %arg5: memref<1x128xf32, #tpu.memory_space<vmem>>, %arg6: memref<128x128xbf16, #tpu.memory_space<vmem>>, %arg7: memref<1x128xf32, #tpu.memory_space<vmem>>, %arg8: memref<16x128xf32, #tpu.memory_space<vmem>>) attributes {dimension_semantics = [#tpu.dimension_semantics<parallel>], iteration_bounds = array<i64: 1>, scalar_prefetch = 0 : i64, scratch_operands = 0 : i64, tpu.core_type = #tpu.core_type<tc>, window_params = [{transform_indices = @transform_0, window_bounds = array<i64: 16, 16>}, {pipeline_mode = #tpu.pipeline_mode<synchronous>, transform_indices = @transform_1, window_bounds = array<i64: 16, 128>}, {pipeline_mode = #tpu.pipeline_mode<synchronous>, transform_indices = @transform_2, window_bounds = array<i64: 1, 128>}, {pipeline_mode = #tpu.pipeline_mode<synchronous>, transform_indices = @transform_3, window_bounds = array<i64: 128, 128>}, {pipeline_mode = #tpu.pipeline_mode<synchronous>, transform_indices = @transform_4, window_bounds = array<i64: 1, 128>}, {pipeline_mode = #tpu.pipeline_mode<synchronous>, transform_indices = @transform_5, window_bounds = array<i64: 128, 128>}, {pipeline_mode = #tpu.pipeline_mode<synchronous>, transform_indices = @transform_6, window_bounds = array<i64: 1, 128>}, {transform_indices = @transform_7, window_bounds = array<i64: 16, 128>}]} {
    %c0 = arith.constant 0 : index
    %c0_0 = arith.constant 0 : index
    %0 = vector.load %arg1[%c0, %c0_0] : memref<16x16xbf16, #tpu.memory_space<vmem>>, vector<16x16xbf16>
    %c0_1 = arith.constant 0 : index
    %c0_2 = arith.constant 0 : index
    %1 = vector.load %arg2[%c0_1, %c0_2] : memref<16x128xbf16, #tpu.memory_space<vmem>>, vector<16x128xbf16>
    %cst = arith.constant dense<0.000000e+00> : vector<16x128xf32>
    %2 = tpu.matmul %0, %1, %cst {dimension_numbers = #tpu.dot_dimension_numbers<[1], [0], [0], [1], [0, 0, 1, 1], [], []>} : vector<16x16xbf16>, vector<16x128xbf16>, vector<16x128xf32> -> vector<16x128xf32>
    %c0_3 = arith.constant 0 : index
    %c0_4 = arith.constant 0 : index
    %3 = vector.load %arg3[%c0_3, %c0_4] : memref<1x128xf32, #tpu.memory_space<vmem>>, vector<1x128xf32>
    %4 = vector.broadcast %3 : vector<1x128xf32> to vector<16x128xf32>
    %5 = arith.addf %2, %4 : vector<16x128xf32>
    %cst_5 = arith.constant 0.000000e+00 : f32
    %6 = vector.broadcast %cst_5 : f32 to vector<16x128xf32>
    %7 = arith.maximumf %5, %6 : vector<16x128xf32>
    %8 = arith.truncf %7 : vector<16x128xf32> to vector<16x128xbf16>
    %c0_6 = arith.constant 0 : index
    %c0_7 = arith.constant 0 : index
    %9 = vector.load %arg4[%c0_6, %c0_7] : memref<128x128xbf16, #tpu.memory_space<vmem>>, vector<128x128xbf16>
    %cst_8 = arith.constant dense<0.000000e+00> : vector<16x128xf32>
    %10 = tpu.matmul %8, %9, %cst_8 {dimension_numbers = #tpu.dot_dimension_numbers<[1], [0], [0], [1], [0, 0, 1, 1], [], []>} : vector<16x128xbf16>, vector<128x128xbf16>, vector<16x128xf32> -> vector<16x128xf32>
    %c0_9 = arith.constant 0 : index
    %c0_10 = arith.constant 0 : index
    %11 = vector.load %arg5[%c0_9, %c0_10] : memref<1x128xf32, #tpu.memory_space<vmem>>, vector<1x128xf32>
    %12 = vector.broadcast %11 : vector<1x128xf32> to vector<16x128xf32>
    %13 = arith.addf %10, %12 : vector<16x128xf32>
    %cst_11 = arith.constant 0.000000e+00 : f32
    %14 = vector.broadcast %cst_11 : f32 to vector<16x128xf32>
    %15 = arith.maximumf %13, %14 : vector<16x128xf32>
    %16 = arith.truncf %15 : vector<16x128xf32> to vector<16x128xbf16>
    %c0_12 = arith.constant 0 : index
    %c0_13 = arith.constant 0 : index
    %17 = vector.load %arg6[%c0_12, %c0_13] : memref<128x128xbf16, #tpu.memory_space<vmem>>, vector<128x128xbf16>
    %cst_14 = arith.constant dense<0.000000e+00> : vector<16x128xf32>
    %18 = tpu.matmul %16, %17, %cst_14 {dimension_numbers = #tpu.dot_dimension_numbers<[1], [0], [0], [1], [0, 0, 1, 1], [], []>} : vector<16x128xbf16>, vector<128x128xbf16>, vector<16x128xf32> -> vector<16x128xf32>
    %c0_15 = arith.constant 0 : index
    %c0_16 = arith.constant 0 : index
    %19 = vector.load %arg7[%c0_15, %c0_16] : memref<1x128xf32, #tpu.memory_space<vmem>>, vector<1x128xf32>
    %20 = vector.broadcast %19 : vector<1x128xf32> to vector<16x128xf32>
    %21 = arith.addf %18, %20 : vector<16x128xf32>
    %c0_17 = arith.constant 0 : index
    %c0_18 = arith.constant 0 : index
    %22 = vector.load %arg8[%c0_17, %c0_18] : memref<16x128xf32, #tpu.memory_space<vmem>>, vector<16x128xf32>
    tpu.vector_store %arg8[%c0_17, %c0_18], %21 {strides = array<i32>} : memref<16x128xf32, #tpu.memory_space<vmem>>, vector<16x128xf32>,
    return
  }
  func.func @transform_0(%arg0: i32) -> (i32, i32) {
    %c0_i32 = arith.constant 0 : i32
    %c0_i32_0 = arith.constant 0 : i32
    return %arg0, %c0_i32 : i32, i32
  }
  func.func @transform_1(%arg0: i32) -> (i32, i32) {
    %c0_i32 = arith.constant 0 : i32
    %c0_i32_0 = arith.constant 0 : i32
    %c0_i32_1 = arith.constant 0 : i32
    return %c0_i32, %c0_i32_0 : i32, i32
  }
  func.func @transform_2(%arg0: i32) -> (i32, i32) {
    %c0_i32 = arith.constant 0 : i32
    %c0_i32_0 = arith.constant 0 : i32
    %c0_i32_1 = arith.constant 0 : i32
    return %c0_i32, %c0_i32_0 : i32, i32
  }
  func.func @transform_3(%arg0: i32) -> (i32, i32) {
    %c0_i32 = arith.constant 0 : i32
    %c0_i32_0 = arith.constant 0 : i32
    %c0_i32_1 = arith.constant 0 : i32
    return %c0_i32, %c0_i32_0 : i32, i32
  }
  func.func @transform_4(%arg0: i32) -> (i32, i32) {
    %c0_i32 = arith.constant 0 : i32
    %c0_i32_0 = arith.constant 0 : i32
    %c0_i32_1 = arith.constant 0 : i32
    return %c0_i32, %c0_i32_0 : i32, i32
  }
  func.func @transform_5(%arg0: i32) -> (i32, i32) {
    %c0_i32 = arith.constant 0 : i32
    %c0_i32_0 = arith.constant 0 : i32
    %c0_i32_1 = arith.constant 0 : i32
    return %c0_i32, %c0_i32_0 : i32, i32
  }
  func.func @transform_6(%arg0: i32) -> (i32, i32) {
    %c0_i32 = arith.constant 0 : i32
    %c0_i32_0 = arith.constant 0 : i32
    %c0_i32_1 = arith.constant 0 : i32
    return %c0_i32, %c0_i32_0 : i32, i32
  }
  func.func @transform_7(%arg0: i32) -> (i32, i32) {
    %c0_i32 = arith.constant 0 : i32
    %c0_i32_0 = arith.constant 0 : i32
    return %arg0, %c0_i32 : i32, i32
  }
}

module attributes {stable_mosaic.version = 11 : i64} {
  func.func @_fused_mlp_kernel(%arg0: i32, %arg1: memref<16x16xbf16, #tpu.memory_space<vmem>>, %arg2: memref<16x128xbf16, #tpu.memory_space<vmem>>, %arg3: memref<1x128xf32, #tpu.memory_space<vmem>>, %arg4: memref<128x128xbf16, #tpu.memory_space<vmem>>, %arg5: memref<1x128xf32, #tpu.memory_space<vmem>>, %arg6: memref<128x128xbf16, #tpu.memory_space<vmem>>, %arg7: memref<1x128xf32, #tpu.memory_space<vmem>>, %arg8: memref<16x128xf32, #tpu.memory_space<vmem>>) attributes {dimension_semantics = [#tpu.dimension_semantics<parallel>], iteration_bounds = array<i64: 1>, scalar_prefetch = 0 : i64, scratch_operands = 0 : i64, tpu.core_type = #tpu.core_type<tc>, window_params = [{transform_indices = @transform_0, window_bounds = array<i64: 16, 16>}, {pipeline_mode = #tpu.pipeline_mode<synchronous>, transform_indices = @transform_1, window_bounds = array<i64: 16, 128>}, {pipeline_mode = #tpu.pipeline_mode<synchronous>, transform_indices = @transform_2, window_bounds = array<i64: 1, 128>}, {pipeline_mode = #tpu.pipeline_mode<synchronous>, transform_indices = @transform_3, window_bounds = array<i64: 128, 128>}, {pipeline_mode = #tpu.pipeline_mode<synchronous>, transform_indices = @transform_4, window_bounds = array<i64: 1, 128>}, {pipeline_mode = #tpu.pipeline_mode<synchronous>, transform_indices = @transform_5, window_bounds = array<i64: 128, 128>}, {pipeline_mode = #tpu.pipeline_mode<synchronous>, transform_indices = @transform_6, window_bounds = array<i64: 1, 128>}, {transform_indices = @transform_7, window_bounds = array<i64: 16, 128>}]} {
    %c0 = arith.constant 0 : index
    %c0_0 = arith.constant 0 : index
    %0 = vector.load %arg1[%c0, %c0_0] : memref<16x16xbf16, #tpu.memory_space<vmem>>, vector<16x16xbf16>
    %c0_1 = arith.constant 0 : index
    %c0_2 = arith.constant 0 : index
    %1 = vector.load %arg2[%c0_1, %c0_2] : memref<16x128xbf16, #tpu.memory_space<vmem>>, vector<16x128xbf16>
    %cst = arith.constant dense<0.000000e+00> : vector<16x128xf32>
    %2 = tpu.matmul %0, %1, %cst {dimension_numbers = #tpu.dot_dimension_numbers<[1], [0], [0], [1], [0, 0, 1, 1], [], []>} : vector<16x16xbf16>, vector<16x128xbf16>, vector<16x128xf32> -> vector<16x128xf32>
    %c0_3 = arith.constant 0 : index
    %c0_4 = arith.constant 0 : index
    %3 = vector.load %arg3[%c0_3, %c0_4] : memref<1x128xf32, #tpu.memory_space<vmem>>, vector<1x128xf32>
    %4 = vector.broadcast %3 : vector<1x128xf32> to vector<16x128xf32>
    %5 = arith.addf %2, %4 : vector<16x128xf32>
    %cst_5 = arith.constant 0.000000e+00 : f32
    %6 = vector.broadcast %cst_5 : f32 to vector<16x128xf32>
    %7 = arith.maximumf %5, %6 : vector<16x128xf32>
    %8 = arith.truncf %7 : vector<16x128xf32> to vector<16x128xbf16>
    %c0_6 = arith.constant 0 : index
    %c0_7 = arith.constant 0 : index
    %9 = vector.load %arg4[%c0_6, %c0_7] : memref<128x128xbf16, #tpu.memory_space<vmem>>, vector<128x128xbf16>
    %cst_8 = arith.constant dense<0.000000e+00> : vector<16x128xf32>
    %10 = tpu.matmul %8, %9, %cst_8 {dimension_numbers = #tpu.dot_dimension_numbers<[1], [0], [0], [1], [0, 0, 1, 1], [], []>} : vector<16x128xbf16>, vector<128x128xbf16>, vector<16x128xf32> -> vector<16x128xf32>
    %c0_9 = arith.constant 0 : index
    %c0_10 = arith.constant 0 : index
    %11 = vector.load %arg5[%c0_9, %c0_10] : memref<1x128xf32, #tpu.memory_space<vmem>>, vector<1x128xf32>
    %12 = vector.broadcast %11 : vector<1x128xf32> to vector<16x128xf32>
    %13 = arith.addf %10, %12 : vector<16x128xf32>
    %cst_11 = arith.constant 0.000000e+00 : f32
    %14 = vector.broadcast %cst_11 : f32 to vector<16x128xf32>
    %15 = arith.maximumf %13, %14 : vector<16x128xf32>
    %16 = arith.truncf %15 : vector<16x128xf32> to vector<16x128xbf16>
    %c0_12 = arith.constant 0 : index
    %c0_13 = arith.constant 0 : index
    %17 = vector.load %arg6[%c0_12, %c0_13] : memref<128x128xbf16, #tpu.memory_space<vmem>>, vector<128x128xbf16>
    %cst_14 = arith.constant dense<0.000000e+00> : vector<16x128xf32>
    %18 = tpu.matmul %16, %17, %cst_14 {dimension_numbers = #tpu.dot_dimension_numbers<[1], [0], [0], [1], [0, 0, 1, 1], [], []>} : vector<16x128xbf16>, vector<128x128xbf16>, vector<16x128xf32> -> vector<16x128xf32>
    %c0_15 = arith.constant 0 : index
    %c0_16 = arith.constant 0 : index
    %19 = vector.load %arg7[%c0_15, %c0_16] : memref<1x128xf32, #tpu.memory_space<vmem>>, vector<1x128xf32>
    %20 = vector.broadcast %19 : vector<1x128xf32> to vector<16x128xf32>
    %21 = arith.addf %18, %20 : vector<16x128xf32>
    %c0_17 = arith.constant 0 : index
    %c0_18 = arith.constant 0 : index
    %22 = vector.load %arg8[%c0_17, %c0_18] : memref<16x128xf32, #tpu.memory_space<vmem>>, vector<16x128xf32>
    tpu.vector_store %arg8[%c0_17, %c0_18], %21 {strides = array<i32>} : memref<16x128xf32, #tpu.memory_space<vmem>>, vector<16x128xf32>,
    return
  }
  func.func @transform_0(%arg0: i32) -> (i32, i32) {
    %c0_i32 = arith.constant 0 : i32
    %c0_i32_0 = arith.constant 0 : i32
    return %arg0, %c0_i32 : i32, i32
  }
  func.func @transform_1(%arg0: i32) -> (i32, i32) {
    %c0_i32 = arith.constant 0 : i32
    %c0_i32_0 = arith.constant 0 : i32
    %c0_i32_1 = arith.constant 0 : i32
    return %c0_i32, %c0_i32_0 : i32, i32
  }
  func.func @transform_2(%arg0: i32) -> (i32, i32) {
    %c0_i32 = arith.constant 0 : i32
    %c0_i32_0 = arith.constant 0 : i32
    %c0_i32_1 = arith.constant 0 : i32
    return %c0_i32, %c0_i32_0 : i32, i32
  }
  func.func @transform_3(%arg0: i32) -> (i32, i32) {
    %c0_i32 = arith.constant 0 : i32
    %c0_i32_0 = arith.constant 0 : i32
    %c0_i32_1 = arith.constant 0 : i32
    return %c0_i32, %c0_i32_0 : i32, i32
  }
  func.func @transform_4(%arg0: i32) -> (i32, i32) {
    %c0_i32 = arith.constant 0 : i32
    %c0_i32_0 = arith.constant 0 : i32
    %c0_i32_1 = arith.constant 0 : i32
    return %c0_i32, %c0_i32_0 : i32, i32
  }
  func.func @transform_5(%arg0: i32) -> (i32, i32) {
    %c0_i32 = arith.constant 0 : i32
    %c0_i32_0 = arith.constant 0 : i32
    %c0_i32_1 = arith.constant 0 : i32
    return %c0_i32, %c0_i32_0 : i32, i32
  }
  func.func @transform_6(%arg0: i32) -> (i32, i32) {
    %c0_i32 = arith.constant 0 : i32
    %c0_i32_0 = arith.constant 0 : i32
    %c0_i32_1 = arith.constant 0 : i32
    return %c0_i32, %c0_i32_0 : i32, i32
  }
  func.func @transform_7(%arg0: i32) -> (i32, i32) {
    %c0_i32 = arith.constant 0 : i32
    %c0_i32_0 = arith.constant 0 : i32
    return %arg0, %c0_i32 : i32, i32
  }
}

</mosaic_0001>

<bundles_post_ra>
// kernel: tpu_custom_call.1
= control target key start
LH: loop header
LB: loop body
LE: loop exit
PB: predicated region body
PF: predicated region fallthrough
CT: control target
= control target key end

     0   :  { %12 = vsyncpa [#allocation3], 0  ;;  %s733_s0 = inlined_call_operand.hbm [shape: bf16[16,16], index: 0, kind: input, shape index: {}]   ;;  %s734_s1 = inlined_call_operand.hbm [shape: bf16[16,128], index: 1, kind: input, shape index: {}]   ;;  %s735_s2 = inlined_call_operand.vmem [shape: f32[1,128], index: 2, kind: input, shape index: {}]   ;;  %s736_s3 = inlined_call_operand.hbm [shape: bf16[128,128], index: 3, kind: input, shape index: {}]   ;;  %s737_s4 = inlined_call_operand.vmem [shape: f32[1,128], index: 4, kind: input, shape index: {}]   ;;  %s738_s5 = inlined_call_operand.hbm [shape: bf16[128,128], index: 5, kind: input, shape index: {}]   ;;  %s739_s6 = inlined_call_operand.vmem [shape: f32[1,128], index: 6, kind: input, shape index: {}]   ;;  %s740_s7 = inlined_call_operand.hbm [shape: f32[16,128], index: 7, kind: output, shape index: {}]  }
   0x1   :  { %13 = vsyncpa [#allocation6], 0 }
   0x2   :  { %14 = vsyncpa [#allocation9], 0 }
   0x3   :  { %15 = vsyncpa [#allocation4], 0  ;;  %s626_s24 = smov [#allocation5]   ;;  %s627_s26 = smov [#allocation2]  }
   0x4   :  { %s33_s25 = sshll.u32 %s626_s24, 4  ;;  %s21_s27 = sshll.u32 %s627_s26, 4  ;;  %s34_s25 = int_to_ptr.vmem [resolvable:$true] %s33_s25  ;;  %s22_s27 = int_to_ptr.vmem [resolvable:$true] %s21_s27 }
   0x5   :  { %s526_s28 = scalar_lea.vmem %s34_s25, 128  ;;  %p531_p1 = scmp.lt.s32.totalorder %s34_s25, %s34_s25 }
   0x6   :  { %p527_p0 = scmp.ne.s32.totalorder %s34_s25, %s526_s28  ;;  %p532_p2 = scmp.lt.s32.totalorder %s526_s28, %s526_s28 }
   0x8   :  { %p533_p3 = por %p532_p2, %p531_p1 }
   0xa   :  { %p534_p4 = pnand %p533_p3, %p527_p0 }
   0xc   :  { %537 = shalt.err (!%p534_p4)
}
   0xd   :  { %s628_s29 = smov 64   ;;  %s629_s30 = smov 4  }
   0xe   :  { %39 = dma.hbm_to_vmem [thread:$0]  %s734_s1, 128, %s34_s25, [#allocation6], %s628_s29, %s628_s29, %s629_s30  }
   0xf   :  { %s546_s10 = scalar_lea.vmem %s22_s27, 128  ;;  %p551_p6 = scmp.lt.s32.totalorder %s22_s27, %s22_s27 }
  0x10   :  { %p547_p5 = scmp.ne.s32.totalorder %s22_s27, %s546_s10  ;;  %p552_p7 = scmp.lt.s32.totalorder %s546_s10, %s546_s10 }
  0x12   :  { %p553_p8 = por %p552_p7, %p551_p6 }
  0x14   :  { %p554_p9 = pnand %p553_p8, %p547_p5 }
  0x16   :  { %557 = shalt.err (!%p554_p9)
}
  0x17   :  { %27 = dma.hbm_to_vmem [thread:$0]  %s733_s0, 128, %s22_s27, [#allocation3], %s628_s29, %s628_s29, %s629_s30  }
  0x18   :  { %s630_s13 = smov [#allocation7]   ;;  %s631_s15 = smov [#allocation8]  }
  0x19   :  { %s47_s14 = sshll.u32 %s630_s13, 4  ;;  %s61_s16 = sshll.u32 %s631_s15, 4  ;;  %s48_s14 = int_to_ptr.vmem [resolvable:$true] %s47_s14  ;;  %s62_s16 = int_to_ptr.vmem [resolvable:$true] %s61_s16 }
  0x1a   :  { %s566_s1 = scalar_lea.vmem %s48_s14, 1024  ;;  %p571_p11 = scmp.lt.s32.totalorder %s48_s14, %s48_s14 }
  0x1b   :  { %p567_p10 = scmp.ne.s32.totalorder %s48_s14, %s566_s1  ;;  %p572_p12 = scmp.lt.s32.totalorder %s566_s1, %s566_s1 }
  0x1d   :  { %p573_p13 = por %p572_p12, %p571_p11 }
  0x1f   :  { %p574_p0 = pnand %p573_p13, %p567_p10 }
  0x21   :  { %577 = shalt.err (!%p574_p0)
}
  0x22   :  { %53 = dma.hbm_to_vmem [thread:$0]  %s736_s3, 1024, %s48_s14, [#allocation6], %s628_s29, %s628_s29, %s629_s30  }
  0x23   :  { %s586_s0 = scalar_lea.vmem %s62_s16, 1024  ;;  %p591_p2 = scmp.lt.s32.totalorder %s62_s16, %s62_s16 }
  0x24   :  { %p587_p1 = scmp.ne.s32.totalorder %s62_s16, %s586_s0  ;;  %p592_p3 = scmp.lt.s32.totalorder %s586_s0, %s586_s0 }
  0x26   :  { %p593_p4 = por %p592_p3, %p591_p2 }
  0x28   :  { %p594_p5 = pnand %p593_p4, %p587_p1 }
  0x2a   :  { %597 = shalt.err (!%p594_p5)
}
  0x2b   :  { %67 = dma.hbm_to_vmem [thread:$0]  %s738_s5, 1024, %s62_s16, [#allocation9], %s628_s29, %s628_s29, %s629_s30  }
  0x2c   :  { %618 = dma.done.wait [#allocation3], 128  }
  0x2d   :  { %619 = vsyncadd [#allocation3], 4294967168 }
  0x2e   :  { %620 = dma.done.wait [#allocation6], 1152  }
  0x2f   :  { %621 = vsyncadd [#allocation6], 4294966144 }
  0x30   :  { %622 = dma.done.wait [#allocation9], 1024  }
  0x31   :  { %623 = vsyncadd [#allocation9], 4294966272  ;;  %v632_v0 = vmov 0.0   ;;  %vm633_vm0 = vmmov 0   ;;  %v500_v1 = vld [vmem:[#allocation5] sm:$0xff]   ;;  %v501_v2 = vld [vmem:[#allocation2] sm:$0xff]  }
  0x32   :  { %443 = vmatprep.subr.bf16.mxu0 %v632_v0  ;;  %445 = vmatprep.mubr.msk.bf16.mxu0 %vm633_vm0, %v632_v0  ;;  %vm105_vm1 = vcmask 130048   ;;  %v502_v3 = vld [vmem:[#allocation7 + $0x38] sm:$0xff]   ;;  %v503_v4 = vld [vmem:[#allocation7 + $0x30] sm:$0xff]   ;;  %v504_v5 = vld [vmem:[#allocation7 + $0x28] sm:$0xff]   ;;  %s634_s24 = smov [#allocation10]  }
  0x33   :  { %449 = vmatprep.subr.bf16.mxu1 %v632_v0  ;;  %465 = vmatprep.mubr.msk.bf16.mxu1 %vm633_vm0, %v632_v0  ;;  %v505_v6 = vld [vmem:[#allocation7 + $0x20] sm:$0xff]   ;;  %v506_v7 = vld [vmem:[#allocation7 + $0x18] sm:$0xff]   ;;  %v507_v8 = vld [vmem:[#allocation7 + $0x10] sm:$0xff]   ;;  %s387_s25 = sshll.u32 %s634_s24, 4  ;;  %s388_s25 = int_to_ptr.vmem [resolvable:$true] %s387_s25 }
  0x34   :  { %444 = vmatpush3.bf16.msra.mxu0 %v500_v1  ;;  %450 = vmatpush3.bf16.msra.mxu1 %v502_v3  ;;  %v508_v9 = vld [vmem:[#allocation7 + $0x8] sm:$0xff]   ;;  %v509_v10 = vld [vmem:[#allocation7] sm:$0xff]   ;;  %v510_v11 = vld [vmem:[#allocation8 + $0x38] sm:$0xff]   ;;  %p603_p7 = scmp.lt.s32.totalorder %s388_s25, %s388_s25 }
  0x35   :  { %469 = vmatprep.subr.bf16.mxu0 %v632_v0  ;;  %451 = vmatprep.subr.bf16.mxu1 %v632_v0  ;;  %v511_v12 = vld [vmem:[#allocation8 + $0x30] sm:$0xff]   ;;  %v512_v13 = vld [vmem:[#allocation8 + $0x28] sm:$0xff]   ;;  %v513_v14 = vld [vmem:[#allocation8 + $0x20] sm:$0xff]  }
  0x36   :  { %v514_v15 = vld [vmem:[#allocation8 + $0x18] sm:$0xff]   ;;  %v401_v16 = vld [vmem:[%s735_s2] ss:$0 sm:$0xff]  ;;  %v516_v27 = vld [vmem:[#allocation8 + $0x8] sm:$0xff]  }
  0x37   :  { %446 = vmatmul.mubr.msk.bf16.vlgmr.msra.gmra.mxu0 %vm105_vm1, %v501_v2  ;;  %v515_v26 = vld [vmem:[#allocation8 + $0x10] sm:$0xff]   ;;  %v517_v28 = vld [vmem:[#allocation8] sm:$0xff]  }
  0x38   :  { %485 = vmatprep.mubr.msk.bf16.mxu0 %vm633_vm0, %v632_v0  ;;  %452 = vmatpush3.bf16.msra.mxu1 %v503_v4  ;;  %v405_v29 = vld [vmem:[%s737_s4] ss:$0 sm:$0xff]  ;;  %s598_s4 = scalar_lea.vmem %s388_s25, 256 }
  0x39   :  { %453 = vmatprep.subr.bf16.mxu1 %v632_v0  ;;  %470 = vmatpush3.bf16.msra.mxu0 %v510_v11  ;;  %v414_v39 = vld [vmem:[%s739_s6] ss:$0 sm:$0xff]  ;;  %p599_p6 = scmp.ne.s32.totalorder %s388_s25, %s598_s4  ;;  %p604_p8 = scmp.lt.s32.totalorder %s598_s4, %s598_s4 }
  0x3a   :  { %471 = vmatprep.subr.bf16.mxu0 %v632_v0 }
  0x3b   :  { %p605_p9 = por %p604_p8, %p603_p7 }
  0x3c   :  { %454 = vmatpush3.bf16.msra.mxu1 %v504_v5 }
  0x3d   :  { %455 = vmatprep.subr.bf16.mxu1 %v632_v0  ;;  %472 = vmatpush3.bf16.msra.mxu0 %v511_v12  ;;  %p606_p10 = pnand %p605_p9, %p599_p6 }
  0x3e   :  { %473 = vmatprep.subr.bf16.mxu0 %v632_v0 }
  0x40   :  { %456 = vmatpush3.bf16.msra.mxu1 %v505_v6 }
  0x41   :  { %457 = vmatprep.subr.bf16.mxu1 %v632_v0  ;;  %474 = vmatpush3.bf16.msra.mxu0 %v512_v13 }
  0x42   :  { %475 = vmatprep.subr.bf16.mxu0 %v632_v0 }
  0x44   :  { %458 = vmatpush3.bf16.msra.mxu1 %v506_v7 }
  0x45   :  { %459 = vmatprep.subr.bf16.mxu1 %v632_v0  ;;  %476 = vmatpush3.bf16.msra.mxu0 %v513_v14 }
  0x46   :  { %477 = vmatprep.subr.bf16.mxu0 %v632_v0 }
  0x48   :  { %460 = vmatpush3.bf16.msra.mxu1 %v507_v8 }
  0x49   :  { %461 = vmatprep.subr.bf16.mxu1 %v632_v0  ;;  %478 = vmatpush3.bf16.msra.mxu0 %v514_v15 }
  0x4a   :  { %479 = vmatprep.subr.bf16.mxu0 %v632_v0 }
  0x4c   :  { %462 = vmatpush3.bf16.msra.mxu1 %v508_v9 }
  0x4d   :  { %463 = vmatprep.subr.bf16.mxu1 %v632_v0  ;;  %480 = vmatpush3.bf16.msra.mxu0 %v515_v26 }
  0x4e   :  { %481 = vmatprep.subr.bf16.mxu0 %v632_v0 }
  0x50   :  { %464 = vmatpush3.bf16.msra.mxu1 %v509_v10 }
  0x51   :  { %482 = vmatpush3.bf16.msra.mxu0 %v516_v27 }
  0x52   :  { %483 = vmatprep.subr.bf16.mxu0 %v632_v0 }
  0x55   :  { %484 = vmatpush3.bf16.msra.mxu0 %v517_v28 }
  0xf7   :  { %v143_v17 = vpop.f32.mrf.mxu0 }
  0xf8   :  { %v144_v19 = vadd.f32 %v401_v16, %v143_v17 }
  0xf9   :  { %v447_v18 = vpop.f32.mrf.mxu0 }
  0xfa   :  { %v150_v23 = vmax.f32 %v144_v19, 0.0 }
  0xfb   :  { %v146_v20 = vpop.f32.mrf.mxu0 }
  0xfc   :  { %v147_v21 = vadd.f32 %v401_v16, %v146_v20 }
  0xfd   :  { %v448_v22 = vpop.f32.mrf.mxu0 }
  0xfe   :  { %v151_v24 = vmax.f32 %v147_v21, 0.0 }
 0x100   :  { %v152_v25 = vpack.c.bf16 %v151_v24, %v150_v23 }
 0x102   :  { %466 = vmatmul.mubr.bf16.vlgmr.msra.gmra.mxu1 %v152_v25 }
 0x1c2   :  { %v258_v30 = vpop.f32.mrf.mxu1 }
 0x1c3   :  { %v259_v32 = vadd.f32 %v405_v29, %v258_v30 }
 0x1c4   :  { %v467_v31 = vpop.f32.mrf.mxu1 }
 0x1c5   :  { %v265_v36 = vmax.f32 %v259_v32, 0.0 }
 0x1c6   :  { %v261_v33 = vpop.f32.mrf.mxu1 }
 0x1c7   :  { %v262_v34 = vadd.f32 %v405_v29, %v261_v33 }
 0x1c8   :  { %v468_v35 = vpop.f32.mrf.mxu1 }
 0x1c9   :  { %v266_v37 = vmax.f32 %v262_v34, 0.0 }
 0x1cb   :  { %v267_v38 = vpack.c.bf16 %v266_v37, %v265_v36 }
 0x1cd   :  { %486 = vmatmul.mubr.bf16.vlgmr.msra.gmra.mxu0 %v267_v38 }
 0x28d   :  { %v373_v40 = vpop.f32.mrf.mxu0 }
 0x28e   :  { %v374_v41 = vadd.f32 %v414_v39, %v373_v40 }
 0x28f   :  { %v487_v42 = vpop.f32.mrf.mxu0 }
 0x290   :  { %380 = vst [vmem:[#allocation10] sm:$0xff] %v374_v41 }
 0x291   :  { %v376_v43 = vpop.f32.mrf.mxu0 }
 0x292   :  { %v377_v44 = vadd.f32 %v414_v39, %v376_v43 }
 0x293   :  { %v488_v45 = vpop.f32.mrf.mxu0 }
 0x294   :  { %381 = vst [vmem:[#allocation10 + $0x8] sm:$0xff] %v377_v44 }
 0x295   :  { %609 = shalt.err (!%p606_p10)
}
 0x296   :  { %s635_s26 = smov 128   ;;  %s636_s6 = smov 8  }
 0x297   :  { %393 = dma.vmem_to_hbm [thread:$0]  %s388_s25, 256, %s740_s7, [#allocation4], %s635_s26, %s635_s26, %s636_s6  }
 0x298   :  { %624 = dma.done.wait [#allocation4], 256  }
 0x299   :  { %625 = vsyncadd [#allocation4], 4294967040 }
 0x29a   :  { %397 = vsyncpa [#allocation3], 1 }
 0x29b   :  { %398 = vsyncpa [#allocation6], 1 }
 0x29c   :  { %399 = vsyncpa [#allocation9], 1 }
 0x29d   :  { %400 = vsyncpa [#allocation4], 1 }

// kernel: tpu_custom_call.1
= control target key start
LH: loop header
LB: loop body
LE: loop exit
PB: predicated region body
PF: predicated region fallthrough
CT: control target
= control target key end

     0   :  { %12 = vsyncpa [#allocation3], 0  ;;  %s733_s0 = inlined_call_operand.hbm [shape: bf16[16,16], index: 0, kind: input, shape index: {}]   ;;  %s734_s1 = inlined_call_operand.hbm [shape: bf16[16,128], index: 1, kind: input, shape index: {}]   ;;  %s735_s2 = inlined_call_operand.vmem [shape: f32[1,128], index: 2, kind: input, shape index: {}]   ;;  %s736_s3 = inlined_call_operand.hbm [shape: bf16[128,128], index: 3, kind: input, shape index: {}]   ;;  %s737_s4 = inlined_call_operand.vmem [shape: f32[1,128], index: 4, kind: input, shape index: {}]   ;;  %s738_s5 = inlined_call_operand.hbm [shape: bf16[128,128], index: 5, kind: input, shape index: {}]   ;;  %s739_s6 = inlined_call_operand.vmem [shape: f32[1,128], index: 6, kind: input, shape index: {}]   ;;  %s740_s7 = inlined_call_operand.hbm [shape: f32[16,128], index: 7, kind: output, shape index: {}]  }
   0x1   :  { %13 = vsyncpa [#allocation6], 0 }
   0x2   :  { %14 = vsyncpa [#allocation9], 0 }
   0x3   :  { %15 = vsyncpa [#allocation4], 0  ;;  %s626_s24 = smov [#allocation5]   ;;  %s627_s26 = smov [#allocation2]  }
   0x4   :  { %s33_s25 = sshll.u32 %s626_s24, 4  ;;  %s21_s27 = sshll.u32 %s627_s26, 4  ;;  %s34_s25 = int_to_ptr.vmem [resolvable:$true] %s33_s25  ;;  %s22_s27 = int_to_ptr.vmem [resolvable:$true] %s21_s27 }
   0x5   :  { %s526_s28 = scalar_lea.vmem %s34_s25, 128  ;;  %p531_p1 = scmp.lt.s32.totalorder %s34_s25, %s34_s25 }
   0x6   :  { %p527_p0 = scmp.ne.s32.totalorder %s34_s25, %s526_s28  ;;  %p532_p2 = scmp.lt.s32.totalorder %s526_s28, %s526_s28 }
   0x8   :  { %p533_p3 = por %p532_p2, %p531_p1 }
   0xa   :  { %p534_p4 = pnand %p533_p3, %p527_p0 }
   0xc   :  { %537 = shalt.err (!%p534_p4)
}
   0xd   :  { %s628_s29 = smov 64   ;;  %s629_s30 = smov 4  }
   0xe   :  { %39 = dma.hbm_to_vmem [thread:$0]  %s734_s1, 128, %s34_s25, [#allocation6], %s628_s29, %s628_s29, %s629_s30  }
   0xf   :  { %s546_s10 = scalar_lea.vmem %s22_s27, 128  ;;  %p551_p6 = scmp.lt.s32.totalorder %s22_s27, %s22_s27 }
  0x10   :  { %p547_p5 = scmp.ne.s32.totalorder %s22_s27, %s546_s10  ;;  %p552_p7 = scmp.lt.s32.totalorder %s546_s10, %s546_s10 }
  0x12   :  { %p553_p8 = por %p552_p7, %p551_p6 }
  0x14   :  { %p554_p9 = pnand %p553_p8, %p547_p5 }
  0x16   :  { %557 = shalt.err (!%p554_p9)
}
  0x17   :  { %27 = dma.hbm_to_vmem [thread:$0]  %s733_s0, 128, %s22_s27, [#allocation3], %s628_s29, %s628_s29, %s629_s30  }
  0x18   :  { %s630_s13 = smov [#allocation7]   ;;  %s631_s15 = smov [#allocation8]  }
  0x19   :  { %s47_s14 = sshll.u32 %s630_s13, 4  ;;  %s61_s16 = sshll.u32 %s631_s15, 4  ;;  %s48_s14 = int_to_ptr.vmem [resolvable:$true] %s47_s14  ;;  %s62_s16 = int_to_ptr.vmem [resolvable:$true] %s61_s16 }
  0x1a   :  { %s566_s1 = scalar_lea.vmem %s48_s14, 1024  ;;  %p571_p11 = scmp.lt.s32.totalorder %s48_s14, %s48_s14 }
  0x1b   :  { %p567_p10 = scmp.ne.s32.totalorder %s48_s14, %s566_s1  ;;  %p572_p12 = scmp.lt.s32.totalorder %s566_s1, %s566_s1 }
  0x1d   :  { %p573_p13 = por %p572_p12, %p571_p11 }
  0x1f   :  { %p574_p0 = pnand %p573_p13, %p567_p10 }
  0x21   :  { %577 = shalt.err (!%p574_p0)
}
  0x22   :  { %53 = dma.hbm_to_vmem [thread:$0]  %s736_s3, 1024, %s48_s14, [#allocation6], %s628_s29, %s628_s29, %s629_s30  }
  0x23   :  { %s586_s0 = scalar_lea.vmem %s62_s16, 1024  ;;  %p591_p2 = scmp.lt.s32.totalorder %s62_s16, %s62_s16 }
  0x24   :  { %p587_p1 = scmp.ne.s32.totalorder %s62_s16, %s586_s0  ;;  %p592_p3 = scmp.lt.s32.totalorder %s586_s0, %s586_s0 }
  0x26   :  { %p593_p4 = por %p592_p3, %p591_p2 }
  0x28   :  { %p594_p5 = pnand %p593_p4, %p587_p1 }
  0x2a   :  { %597 = shalt.err (!%p594_p5)
}
  0x2b   :  { %67 = dma.hbm_to_vmem [thread:$0]  %s738_s5, 1024, %s62_s16, [#allocation9], %s628_s29, %s628_s29, %s629_s30  }
  0x2c   :  { %618 = dma.done.wait [#allocation3], 128  }
  0x2d   :  { %619 = vsyncadd [#allocation3], 4294967168 }
  0x2e   :  { %620 = dma.done.wait [#allocation6], 1152  }
  0x2f   :  { %621 = vsyncadd [#allocation6], 4294966144 }
  0x30   :  { %622 = dma.done.wait [#allocation9], 1024  }
  0x31   :  { %623 = vsyncadd [#allocation9], 4294966272  ;;  %v632_v0 = vmov 0.0   ;;  %vm633_vm0 = vmmov 0   ;;  %v500_v1 = vld [vmem:[#allocation5] sm:$0xff]   ;;  %v501_v2 = vld [vmem:[#allocation2] sm:$0xff]  }
  0x32   :  { %443 = vmatprep.subr.bf16.mxu0 %v632_v0  ;;  %445 = vmatprep.mubr.msk.bf16.mxu0 %vm633_vm0, %v632_v0  ;;  %vm105_vm1 = vcmask 130048   ;;  %v502_v3 = vld [vmem:[#allocation7 + $0x38] sm:$0xff]   ;;  %v503_v4 = vld [vmem:[#allocation7 + $0x30] sm:$0xff]   ;;  %v504_v5 = vld [vmem:[#allocation7 + $0x28] sm:$0xff]   ;;  %s634_s24 = smov [#allocation10]  }
  0x33   :  { %449 = vmatprep.subr.bf16.mxu1 %v632_v0  ;;  %465 = vmatprep.mubr.msk.bf16.mxu1 %vm633_vm0, %v632_v0  ;;  %v505_v6 = vld [vmem:[#allocation7 + $0x20] sm:$0xff]   ;;  %v506_v7 = vld [vmem:[#allocation7 + $0x18] sm:$0xff]   ;;  %v507_v8 = vld [vmem:[#allocation7 + $0x10] sm:$0xff]   ;;  %s387_s25 = sshll.u32 %s634_s24, 4  ;;  %s388_s25 = int_to_ptr.vmem [resolvable:$true] %s387_s25 }
  0x34   :  { %444 = vmatpush3.bf16.msra.mxu0 %v500_v1  ;;  %450 = vmatpush3.bf16.msra.mxu1 %v502_v3  ;;  %v508_v9 = vld [vmem:[#allocation7 + $0x8] sm:$0xff]   ;;  %v509_v10 = vld [vmem:[#allocation7] sm:$0xff]   ;;  %v510_v11 = vld [vmem:[#allocation8 + $0x38] sm:$0xff]   ;;  %p603_p7 = scmp.lt.s32.totalorder %s388_s25, %s388_s25 }
  0x35   :  { %469 = vmatprep.subr.bf16.mxu0 %v632_v0  ;;  %451 = vmatprep.subr.bf16.mxu1 %v632_v0  ;;  %v511_v12 = vld [vmem:[#allocation8 + $0x30] sm:$0xff]   ;;  %v512_v13 = vld [vmem:[#allocation8 + $0x28] sm:$0xff]   ;;  %v513_v14 = vld [vmem:[#allocation8 + $0x20] sm:$0xff]  }
  0x36   :  { %v514_v15 = vld [vmem:[#allocation8 + $0x18] sm:$0xff]   ;;  %v401_v16 = vld [vmem:[%s735_s2] ss:$0 sm:$0xff]  ;;  %v516_v27 = vld [vmem:[#allocation8 + $0x8] sm:$0xff]  }
  0x37   :  { %446 = vmatmul.mubr.msk.bf16.vlgmr.msra.gmra.mxu0 %vm105_vm1, %v501_v2  ;;  %v515_v26 = vld [vmem:[#allocation8 + $0x10] sm:$0xff]   ;;  %v517_v28 = vld [vmem:[#allocation8] sm:$0xff]  }
  0x38   :  { %485 = vmatprep.mubr.msk.bf16.mxu0 %vm633_vm0, %v632_v0  ;;  %452 = vmatpush3.bf16.msra.mxu1 %v503_v4  ;;  %v405_v29 = vld [vmem:[%s737_s4] ss:$0 sm:$0xff]  ;;  %s598_s4 = scalar_lea.vmem %s388_s25, 256 }
  0x39   :  { %453 = vmatprep.subr.bf16.mxu1 %v632_v0  ;;  %470 = vmatpush3.bf16.msra.mxu0 %v510_v11  ;;  %v414_v39 = vld [vmem:[%s739_s6] ss:$0 sm:$0xff]  ;;  %p599_p6 = scmp.ne.s32.totalorder %s388_s25, %s598_s4  ;;  %p604_p8 = scmp.lt.s32.totalorder %s598_s4, %s598_s4 }
  0x3a   :  { %471 = vmatprep.subr.bf16.mxu0 %v632_v0 }
  0x3b   :  { %p605_p9 = por %p604_p8, %p603_p7 }
  0x3c   :  { %454 = vmatpush3.bf16.msra.mxu1 %v504_v5 }
  0x3d   :  { %455 = vmatprep.subr.bf16.mxu1 %v632_v0  ;;  %472 = vmatpush3.bf16.msra.mxu0 %v511_v12  ;;  %p606_p10 = pnand %p605_p9, %p599_p6 }
  0x3e   :  { %473 = vmatprep.subr.bf16.mxu0 %v632_v0 }
  0x40   :  { %456 = vmatpush3.bf16.msra.mxu1 %v505_v6 }
  0x41   :  { %457 = vmatprep.subr.bf16.mxu1 %v632_v0  ;;  %474 = vmatpush3.bf16.msra.mxu0 %v512_v13 }
  0x42   :  { %475 = vmatprep.subr.bf16.mxu0 %v632_v0 }
  0x44   :  { %458 = vmatpush3.bf16.msra.mxu1 %v506_v7 }
  0x45   :  { %459 = vmatprep.subr.bf16.mxu1 %v632_v0  ;;  %476 = vmatpush3.bf16.msra.mxu0 %v513_v14 }
  0x46   :  { %477 = vmatprep.subr.bf16.mxu0 %v632_v0 }
  0x48   :  { %460 = vmatpush3.bf16.msra.mxu1 %v507_v8 }
  0x49   :  { %461 = vmatprep.subr.bf16.mxu1 %v632_v0  ;;  %478 = vmatpush3.bf16.msra.mxu0 %v514_v15 }
  0x4a   :  { %479 = vmatprep.subr.bf16.mxu0 %v632_v0 }
  0x4c   :  { %462 = vmatpush3.bf16.msra.mxu1 %v508_v9 }
  0x4d   :  { %463 = vmatprep.subr.bf16.mxu1 %v632_v0  ;;  %480 = vmatpush3.bf16.msra.mxu0 %v515_v26 }
  0x4e   :  { %481 = vmatprep.subr.bf16.mxu0 %v632_v0 }
  0x50   :  { %464 = vmatpush3.bf16.msra.mxu1 %v509_v10 }
  0x51   :  { %482 = vmatpush3.bf16.msra.mxu0 %v516_v27 }
  0x52   :  { %483 = vmatprep.subr.bf16.mxu0 %v632_v0 }
  0x55   :  { %484 = vmatpush3.bf16.msra.mxu0 %v517_v28 }
  0xf7   :  { %v143_v17 = vpop.f32.mrf.mxu0 }
  0xf8   :  { %v144_v19 = vadd.f32 %v401_v16, %v143_v17 }
  0xf9   :  { %v447_v18 = vpop.f32.mrf.mxu0 }
  0xfa   :  { %v150_v23 = vmax.f32 %v144_v19, 0.0 }
  0xfb   :  { %v146_v20 = vpop.f32.mrf.mxu0 }
  0xfc   :  { %v147_v21 = vadd.f32 %v401_v16, %v146_v20 }
  0xfd   :  { %v448_v22 = vpop.f32.mrf.mxu0 }
  0xfe   :  { %v151_v24 = vmax.f32 %v147_v21, 0.0 }
 0x100   :  { %v152_v25 = vpack.c.bf16 %v151_v24, %v150_v23 }
 0x102   :  { %466 = vmatmul.mubr.bf16.vlgmr.msra.gmra.mxu1 %v152_v25 }
 0x1c2   :  { %v258_v30 = vpop.f32.mrf.mxu1 }
 0x1c3   :  { %v259_v32 = vadd.f32 %v405_v29, %v258_v30 }
 0x1c4   :  { %v467_v31 = vpop.f32.mrf.mxu1 }
 0x1c5   :  { %v265_v36 = vmax.f32 %v259_v32, 0.0 }
 0x1c6   :  { %v261_v33 = vpop.f32.mrf.mxu1 }
 0x1c7   :  { %v262_v34 = vadd.f32 %v405_v29, %v261_v33 }
 0x1c8   :  { %v468_v35 = vpop.f32.mrf.mxu1 }
 0x1c9   :  { %v266_v37 = vmax.f32 %v262_v34, 0.0 }
 0x1cb   :  { %v267_v38 = vpack.c.bf16 %v266_v37, %v265_v36 }
 0x1cd   :  { %486 = vmatmul.mubr.bf16.vlgmr.msra.gmra.mxu0 %v267_v38 }
 0x28d   :  { %v373_v40 = vpop.f32.mrf.mxu0 }
 0x28e   :  { %v374_v41 = vadd.f32 %v414_v39, %v373_v40 }
 0x28f   :  { %v487_v42 = vpop.f32.mrf.mxu0 }
 0x290   :  { %380 = vst [vmem:[#allocation10] sm:$0xff] %v374_v41 }
 0x291   :  { %v376_v43 = vpop.f32.mrf.mxu0 }
 0x292   :  { %v377_v44 = vadd.f32 %v414_v39, %v376_v43 }
 0x293   :  { %v488_v45 = vpop.f32.mrf.mxu0 }
 0x294   :  { %381 = vst [vmem:[#allocation10 + $0x8] sm:$0xff] %v377_v44 }
 0x295   :  { %609 = shalt.err (!%p606_p10)
}
 0x296   :  { %s635_s26 = smov 128   ;;  %s636_s6 = smov 8  }
 0x297   :  { %393 = dma.vmem_to_hbm [thread:$0]  %s388_s25, 256, %s740_s7, [#allocation4], %s635_s26, %s635_s26, %s636_s6  }
 0x298   :  { %624 = dma.done.wait [#allocation4], 256  }
 0x299   :  { %625 = vsyncadd [#allocation4], 4294967040 }
 0x29a   :  { %397 = vsyncpa [#allocation3], 1 }
 0x29b   :  { %398 = vsyncpa [#allocation6], 1 }
 0x29c   :  { %399 = vsyncpa [#allocation9], 1 }
 0x29d   :  { %400 = vsyncpa [#allocation4], 1 }

</bundles_post_ra>
